<compile_context>
chip_gen: v5e
topology: v5e:2x2
jax: 0.10.0
libtpu: 0.0.40
codegen_flags: <defaults>
</compile_context>

<pallas_src>
import jax
import jax.numpy as jnp
from jax import lax
from jax.experimental import pallas as pl
from jax.experimental.pallas import tpu as pltpu

# ---- problem sizes (small, consistent with the module's forward) ------------
NUM_CLASSES = 4          # foreground classes
K = NUM_CLASSES + 1      # logits per query (incl. "no object")
B, Q = 2, 8              # batch, object queries per image
T = 3                    # targets per image (static for synthetic data)
N = B * T                # total matched boxes
NO_OBJ_WEIGHT = 0.1

R = B * Q                # flattened logit / box rows (multiple of 8 for f32)
LANES = 128              # lane-dense output row

# num_boxes = sum(len(t['labels'])) = B*T, world_size == 1, clamped at 1.
# Static under jit -> baked as a compile-time constant (no SMEM operand).
INV_NUM_BOXES = 1.0 / max(float(N), 1.0)


def _fast_recip(x):
    """EUP approximate reciprocal + one Newton step (rel err ~1e-7)."""
    r = pl.reciprocal(x, approx=True)
    return r * (2.0 - x * r)


# ------------------------------ fused Pallas kernel ---------------------------
def _detr_loss_kernel(match_ref, logits_ref, bp_ref, bt_ref, out_ref):
    """Fused DETR losses (weighted CE + L1 + GIoU).

    match_ref:  (2*N,)   i32 SMEM  [0:N]  matched flat query row (b*Q + q)
                                   [N:2N] matched target class label
    logits_ref: (R, K)   f32 VMEM  raw class logits
    bp_ref:     (R, 4)   f32 VMEM  raw predicted boxes (cx, cy, w, h)
    bt_ref:     (N, 4)   f32 VMEM  target boxes in match order
    out_ref:    (1, 128) f32 VMEM  lane 0: CE, lane 1: L1, lane 2: GIoU
    """
    x = logits_ref[...]                                           # (R, K)
    p = bp_ref[...]                                               # (R, 4)
    r = x.shape[0]

    # ---- build per-row target class / matched target box / valid mask -------
    row_iota = lax.broadcasted_iota(jnp.int32, (r, 1), 0)         # (R, 1)
    tgt = jnp.full((r, 1), NUM_CLASSES, dtype=jnp.int32)          # "no object"
    tb = p                                                        # identity => 0 box loss
    valid = jnp.zeros((r, 1), jnp.float32)
    for t in range(N):                                            # static unroll (N small)
        mask = row_iota == match_ref[t]                           # (R, 1) bool
        tgt = jnp.where(mask, match_ref[N + t], tgt)
        tb = jnp.where(mask, bt_ref[t:t + 1, :], tb)              # (1,4) static view
        valid = jnp.where(mask, 1.0, valid)

    # ---- weighted cross-entropy (F.cross_entropy(weight=w, reduction='mean'))
    m = jnp.max(x, axis=-1, keepdims=True)
    lse = jnp.log(jnp.sum(jnp.exp(x - m), axis=-1, keepdims=True)) + m   # (R,1)
    cls_iota = lax.broadcasted_iota(jnp.int32, x.shape, 1)               # (R,K)
    onehot = (cls_iota == tgt).astype(jnp.float32)                       # (R,K)
    tgt_logit = jnp.sum(x * onehot, axis=-1, keepdims=True)              # (R,1)
    # loss_weight buffer == ones(K) with weight[num_classes] = no_obj_weight.
    w_row = jnp.where(tgt == NUM_CLASSES, NO_OBJ_WEIGHT, 1.0)            # (R,1)
    nll = lse - tgt_logit
    ce_num = jnp.sum(w_row * nll, keepdims=True)                         # (1,1)
    ce_den = jnp.sum(w_row, keepdims=True)                               # (1,1)
    ce = ce_num * pl.reciprocal(ce_den, approx=False)                    # exact scalar divide

    # ---- L1 ------------------------------------------------------------------
    l1 = jnp.sum(valid * jnp.sum(jnp.abs(p - tb), axis=-1, keepdims=True),
                 keepdims=True)                                          # (1,1)

    # ---- GIoU ----------------------------------------------------------------
    def xyxy(b):
        cx, cy, w, h = b[:, 0:1], b[:, 1:2], b[:, 2:3], b[:, 3:4]
        return cx - 0.5 * w, cy - 0.5 * h, cx + 0.5 * w, cy + 0.5 * h

    px1, py1, px2, py2 = xyxy(p)
    tx1, ty1, tx2, ty2 = xyxy(tb)
    area_p = (px2 - px1) * (py2 - py1)
    area_t = (tx2 - tx1) * (ty2 - ty1)

    iw = jnp.maximum(jnp.minimum(px2, tx2) - jnp.maximum(px1, tx1), 0.0)
    ih = jnp.maximum(jnp.minimum(py2, ty2) - jnp.maximum(py1, ty1), 0.0)
    inter = iw * ih
    union = area_p + area_t - inter

    cw = jnp.maximum(jnp.maximum(px2, tx2) - jnp.minimum(px1, tx1), 0.0)
    ch = jnp.maximum(jnp.maximum(py2, ty2) - jnp.minimum(py1, ty1), 0.0)
    area_c = cw * ch

    # Sanitize denominators on unmatched rows (their contribution is masked);
    # matched rows keep exact PyTorch semantics.
    # TODO(synk): add an epsilon guard if degenerate (w==0/h==0) *matched*
    # boxes are possible; the PyTorch reference would also produce inf/nan.
    valid_b = valid > 0.0
    union_s = jnp.where(valid_b, union, 1.0)
    area_c_s = jnp.where(valid_b, area_c, 1.0)
    iou = inter * _fast_recip(union_s)
    giou = iou - (area_c_s - union_s) * _fast_recip(area_c_s)
    giou_sum = jnp.sum(valid * (1.0 - giou), keepdims=True)              # (1,1)

    loss_bbox = l1 * INV_NUM_BOXES
    loss_giou = giou_sum * INV_NUM_BOXES

    # ---- pack all three losses into one lane-dense output row ---------------
    lane = lax.broadcasted_iota(jnp.int32, out_ref.shape, 1)             # (1,128)
    out_ref[...] = jnp.where(lane == 0, ce,
                             jnp.where(lane == 1, loss_bbox,
                                       jnp.where(lane == 2, loss_giou, 0.0)))


def _fused_losses_pallas(match_idx, logits, pred_boxes, tgt_boxes):
    return pl.pallas_call(
        _detr_loss_kernel,
        out_shape=jax.ShapeDtypeStruct((1, LANES), jnp.float32),
        in_specs=[
            pl.BlockSpec(memory_space=pltpu.MemorySpace.SMEM),   # match rows + labels
            pl.BlockSpec(memory_space=pltpu.MemorySpace.VMEM),   # logits (R,K)
            pl.BlockSpec(memory_space=pltpu.MemorySpace.VMEM),   # pred boxes (R,4)
            pl.BlockSpec(memory_space=pltpu.MemorySpace.VMEM),   # tgt boxes (N,4)
        ],
        out_specs=pl.BlockSpec(memory_space=pltpu.MemorySpace.VMEM),
    )(match_idx, logits, pred_boxes, tgt_boxes)


# ------------------------------ matcher (vectorized glue) ---------------------
def _greedy_match_single(logits, boxes, labels, tboxes):
    """Deterministic greedy bipartite matcher for one image (stand-in for the
    injected Hungarian matcher). Fully unrolled (T static) -> no while-loop /
    dynamic-update-slice HLOs. Returns (T,) pred indices for targets 0..T-1."""
    prob = jax.nn.softmax(logits, axis=-1)                               # (Q,K)
    cost_class = -prob[:, labels]                                        # (Q,T)
    cost_box = jnp.sum(jnp.abs(boxes[:, None, :] - tboxes[None, :, :]),
                       axis=-1)                                          # (Q,T)
    cost = cost_class + cost_box

    assigned = jnp.zeros((Q,), dtype=bool)
    qs = jnp.arange(Q, dtype=jnp.int32)
    preds = []
    for j in range(T):                                                   # static unroll
        col = jnp.where(assigned, jnp.inf, cost[:, j])
        i = jnp.argmin(col).astype(jnp.int32)
        assigned = assigned | (qs == i)
        preds.append(i)
    return jnp.stack(preds)


# ------------------------------ forward (train) --------------------------------
@jax.jit
def detr_criterion_forward(c_preds, b_preds, tgt_labels, tgt_boxes):
    # TODO(synk): eval branch (get_accuracy / get_mAP) uses data-dependent
    # filtering, sorting and per-element loops -- no clean static-shape Pallas
    # equivalent; not implemented.

    # ---- matcher (vectorized, fully unrolled, runs under jit) ----
    pred_idx = jax.vmap(_greedy_match_single)(
        c_preds, b_preds, tgt_labels, tgt_boxes)                         # (B,T)

    # ---- tiny SMEM side-channel: matched flat row + matched label ----
    batch_idx = jnp.arange(B, dtype=jnp.int32)[:, None]                  # (B,1)
    pred_rows = (batch_idx * Q + pred_idx).reshape(-1).astype(jnp.int32) # (N,)
    labels_flat = tgt_labels.reshape(-1).astype(jnp.int32)               # (N,)
    match_idx = jnp.concatenate([pred_rows, labels_flat])                # (2N,)

    # ---- raw, unpadded kernel operands (reshape-only; no scatter/pad/tile) ----
    logits = c_preds.reshape(R, K).astype(jnp.float32)
    pred_boxes = b_preds.reshape(R, 4).astype(jnp.float32)
    tgt_boxes_flat = tgt_boxes.reshape(N, 4).astype(jnp.float32)

    # ---- hot path: one fused Pallas kernel ----
    out = _fused_losses_pallas(match_idx, logits, pred_boxes, tgt_boxes_flat)
    vals = out[0, :3]                                                    # single slice
    losses = {
        "loss_classes": vals[0],
        "loss_bbox": vals[1],
        "loss_giou": vals[2],
    }
    return losses, pred_idx


# ------------------------------ reference (plain JAX) --------------------------
def _reference_losses(c_preds, b_preds, tgt_labels, tgt_boxes, pred_idx):
    loss_weight = jnp.ones((K,), jnp.float32).at[-1].set(NO_OBJ_WEIGHT)
    batch_idx = jnp.repeat(jnp.arange(B), T)
    pred_flat = pred_idx.reshape(-1)
    labels_flat = tgt_labels.reshape(-1)

    target_classes = jnp.full((B, Q), NUM_CLASSES, dtype=jnp.int32)
    target_classes = target_classes.at[batch_idx, pred_flat].set(labels_flat)

    logits = c_preds.reshape(-1, K).astype(jnp.float32)
    tgt = target_classes.reshape(-1)
    logp = jax.nn.log_softmax(logits, axis=-1)
    nll = -logp[jnp.arange(R), tgt]
    w = loss_weight[tgt]
    ref_ce = jnp.sum(w * nll) / jnp.sum(w)

    p = b_preds[batch_idx, pred_flat].astype(jnp.float32)                # (N,4)
    t = tgt_boxes.reshape(-1, 4).astype(jnp.float32)                     # (N,4)
    nb = max(float(N), 1.0)
    ref_l1 = jnp.sum(jnp.abs(p - t)) / nb

    def xyxy(b):
        return jnp.stack(
            [b[:, 0] - b[:, 2] / 2, b[:, 1] - b[:, 3] / 2,
             b[:, 0] + b[:, 2] / 2, b[:, 1] + b[:, 3] / 2], axis=-1)

    pp, tt = xyxy(p), xyxy(t)
    ap = (pp[:, 2] - pp[:, 0]) * (pp[:, 3] - pp[:, 1])
    at = (tt[:, 2] - tt[:, 0]) * (tt[:, 3] - tt[:, 1])
    iw = jnp.maximum(jnp.minimum(pp[:, 2], tt[:, 2]) - jnp.maximum(pp[:, 0], tt[:, 0]), 0.0)
    ih = jnp.maximum(jnp.minimum(pp[:, 3], tt[:, 3]) - jnp.maximum(pp[:, 1], tt[:, 1]), 0.0)
    inter = iw * ih
    union = ap + at - inter
    iou = inter / union
    cw = jnp.maximum(jnp.maximum(pp[:, 2], tt[:, 2]) - jnp.minimum(pp[:, 0], tt[:, 0]), 0.0)
    ch = jnp.maximum(jnp.maximum(pp[:, 3], tt[:, 3]) - jnp.minimum(pp[:, 1], tt[:, 1]), 0.0)
    area_c = cw * ch
    giou = iou - (area_c - union) / area_c
    ref_giou = jnp.sum(1.0 - giou) / nb
    return ref_ce, ref_l1, ref_giou


# ------------------------------ main ------------------------------------------
if __name__ == "__main__":
    key = jax.random.PRNGKey(0)
    k1, k2, k3, k4 = jax.random.split(key, 4)

    # predictions
    c_preds = jax.random.normal(k1, (B, Q, K), dtype=jnp.float32)
    b_preds = jax.nn.sigmoid(jax.random.normal(k2, (B, Q, 4), dtype=jnp.float32))

    # targets (static T boxes per image)
    tgt_labels = jax.random.randint(k3, (B, T), 0, NUM_CLASSES, dtype=jnp.int32)
    u = jax.random.uniform(k4, (B, T, 4), dtype=jnp.float32)
    tgt_boxes = jnp.stack(
        [0.2 + 0.6 * u[..., 0], 0.2 + 0.6 * u[..., 1],
         0.1 + 0.2 * u[..., 2], 0.1 + 0.2 * u[..., 3]], axis=-1)

    losses, pred_idx = detr_criterion_forward(c_preds, b_preds, tgt_labels,
                                              tgt_boxes)
    losses = jax.block_until_ready(losses)

    ref_ce, ref_l1, ref_giou = _reference_losses(c_preds, b_preds, tgt_labels,
                                                 tgt_boxes, pred_idx)
    assert jnp.allclose(losses["loss_classes"], ref_ce, atol=1e-5, rtol=1e-5)
    assert jnp.allclose(losses["loss_bbox"], ref_l1, atol=1e-5, rtol=1e-5)
    assert jnp.allclose(losses["loss_giou"], ref_giou, atol=1e-5, rtol=1e-5)

    print("KERNEL_OK")
</pallas_src>

<mosaic_0001>
module attributes {stable_mosaic.version = 11 : i64} {
  func.func @_detr_loss_kernel(%arg0: memref<12xi32, #tpu.memory_space<smem>>, %arg1: memref<16x5xf32, #tpu.memory_space<vmem>>, %arg2: memref<16x4xf32, #tpu.memory_space<vmem>>, %arg3: memref<6x4xf32, #tpu.memory_space<vmem>>, %arg4: memref<1x128xf32, #tpu.memory_space<vmem>>) attributes {dimension_semantics = [], scalar_prefetch = 0 : i64, scratch_operands = 0 : i64, tpu.core_type = #tpu.core_type<tc>} {
    %c0 = arith.constant 0 : index
    %c0_0 = arith.constant 0 : index
    %0 = vector.load %arg1[%c0, %c0_0] : memref<16x5xf32, #tpu.memory_space<vmem>>, vector<16x5xf32>
    %c0_1 = arith.constant 0 : index
    %c0_2 = arith.constant 0 : index
    %1 = vector.load %arg2[%c0_1, %c0_2] : memref<16x4xf32, #tpu.memory_space<vmem>>, vector<16x4xf32>
    %2 = tpu.iota {dimensions = array<i32: 0>} : vector<16x1xi32>
    %c4_i32 = arith.constant 4 : i32
    %3 = vector.broadcast %c4_i32 : i32 to vector<16x1xi32>
    %cst = arith.constant 0.000000e+00 : f32
    %4 = vector.broadcast %cst : f32 to vector<16x1xf32>
    %c0_3 = arith.constant 0 : index
    %5 = memref.load %arg0[%c0_3] : memref<12xi32, #tpu.memory_space<smem>>
    %6 = vector.broadcast %5 : i32 to vector<16x1xi32>
    %7 = arith.cmpi eq, %2, %6 : vector<16x1xi32>
    %c6 = arith.constant 6 : index
    %8 = memref.load %arg0[%c6] : memref<12xi32, #tpu.memory_space<smem>>
    %9 = vector.broadcast %8 : i32 to vector<16x1xi32>
    %10 = arith.select %7, %9, %3 : vector<16x1xi1>, vector<16x1xi32>
    %c0_4 = arith.constant 0 : index
    %c0_5 = arith.constant 0 : index
    %11 = vector.load %arg3[%c0_4, %c0_5] : memref<6x4xf32, #tpu.memory_space<vmem>>, vector<1x4xf32>
    %12 = vector.shape_cast %7 : vector<16x1xi1> to vector<16x1xi1>
    %13 = vector.broadcast %12 : vector<16x1xi1> to vector<16x4xi1>
    %14 = vector.shape_cast %11 : vector<1x4xf32> to vector<1x4xf32>
    %15 = vector.broadcast %14 : vector<1x4xf32> to vector<16x4xf32>
    %16 = arith.select %13, %15, %1 : vector<16x4xi1>, vector<16x4xf32>
    %cst_6 = arith.constant 1.000000e+00 : f32
    %17 = vector.broadcast %cst_6 : f32 to vector<16x1xf32>
    %18 = arith.select %7, %17, %4 : vector<16x1xi1>, vector<16x1xf32>
    %c1 = arith.constant 1 : index
    %19 = memref.load %arg0[%c1] : memref<12xi32, #tpu.memory_space<smem>>
    %20 = vector.broadcast %19 : i32 to vector<16x1xi32>
    %21 = arith.cmpi eq, %2, %20 : vector<16x1xi32>
    %c7 = arith.constant 7 : index
    %22 = memref.load %arg0[%c7] : memref<12xi32, #tpu.memory_space<smem>>
    %23 = vector.broadcast %22 : i32 to vector<16x1xi32>
    %24 = arith.select %21, %23, %10 : vector<16x1xi1>, vector<16x1xi32>
    %c1_7 = arith.constant 1 : index
    %c0_8 = arith.constant 0 : index
    %25 = vector.load %arg3[%c1_7, %c0_8] : memref<6x4xf32, #tpu.memory_space<vmem>>, vector<1x4xf32>
    %26 = vector.shape_cast %21 : vector<16x1xi1> to vector<16x1xi1>
    %27 = vector.broadcast %26 : vector<16x1xi1> to vector<16x4xi1>
    %28 = vector.shape_cast %25 : vector<1x4xf32> to vector<1x4xf32>
    %29 = vector.broadcast %28 : vector<1x4xf32> to vector<16x4xf32>
    %30 = arith.select %27, %29, %16 : vector<16x4xi1>, vector<16x4xf32>
    %cst_9 = arith.constant 1.000000e+00 : f32
    %31 = vector.broadcast %cst_9 : f32 to vector<16x1xf32>
    %32 = arith.select %21, %31, %18 : vector<16x1xi1>, vector<16x1xf32>
    %c2 = arith.constant 2 : index
    %33 = memref.load %arg0[%c2] : memref<12xi32, #tpu.memory_space<smem>>
    %34 = vector.broadcast %33 : i32 to vector<16x1xi32>
    %35 = arith.cmpi eq, %2, %34 : vector<16x1xi32>
    %c8 = arith.constant 8 : index
    %36 = memref.load %arg0[%c8] : memref<12xi32, #tpu.memory_space<smem>>
    %37 = vector.broadcast %36 : i32 to vector<16x1xi32>
    %38 = arith.select %35, %37, %24 : vector<16x1xi1>, vector<16x1xi32>
    %c2_10 = arith.constant 2 : index
    %c0_11 = arith.constant 0 : index
    %39 = vector.load %arg3[%c2_10, %c0_11] : memref<6x4xf32, #tpu.memory_space<vmem>>, vector<1x4xf32>
    %40 = vector.shape_cast %35 : vector<16x1xi1> to vector<16x1xi1>
    %41 = vector.broadcast %40 : vector<16x1xi1> to vector<16x4xi1>
    %42 = vector.shape_cast %39 : vector<1x4xf32> to vector<1x4xf32>
    %43 = vector.broadcast %42 : vector<1x4xf32> to vector<16x4xf32>
    %44 = arith.select %41, %43, %30 : vector<16x4xi1>, vector<16x4xf32>
    %cst_12 = arith.constant 1.000000e+00 : f32
    %45 = vector.broadcast %cst_12 : f32 to vector<16x1xf32>
    %46 = arith.select %35, %45, %32 : vector<16x1xi1>, vector<16x1xf32>
    %c3 = arith.constant 3 : index
    %47 = memref.load %arg0[%c3] : memref<12xi32, #tpu.memory_space<smem>>
    %48 = vector.broadcast %47 : i32 to vector<16x1xi32>
    %49 = arith.cmpi eq, %2, %48 : vector<16x1xi32>
    %c9 = arith.constant 9 : index
    %50 = memref.load %arg0[%c9] : memref<12xi32, #tpu.memory_space<smem>>
    %51 = vector.broadcast %50 : i32 to vector<16x1xi32>
    %52 = arith.select %49, %51, %38 : vector<16x1xi1>, vector<16x1xi32>
    %c3_13 = arith.constant 3 : index
    %c0_14 = arith.constant 0 : index
    %53 = vector.load %arg3[%c3_13, %c0_14] : memref<6x4xf32, #tpu.memory_space<vmem>>, vector<1x4xf32>
    %54 = vector.shape_cast %49 : vector<16x1xi1> to vector<16x1xi1>
    %55 = vector.broadcast %54 : vector<16x1xi1> to vector<16x4xi1>
    %56 = vector.shape_cast %53 : vector<1x4xf32> to vector<1x4xf32>
    %57 = vector.broadcast %56 : vector<1x4xf32> to vector<16x4xf32>
    %58 = arith.select %55, %57, %44 : vector<16x4xi1>, vector<16x4xf32>
    %cst_15 = arith.constant 1.000000e+00 : f32
    %59 = vector.broadcast %cst_15 : f32 to vector<16x1xf32>
    %60 = arith.select %49, %59, %46 : vector<16x1xi1>, vector<16x1xf32>
    %c4 = arith.constant 4 : index
    %61 = memref.load %arg0[%c4] : memref<12xi32, #tpu.memory_space<smem>>
    %62 = vector.broadcast %61 : i32 to vector<16x1xi32>
    %63 = arith.cmpi eq, %2, %62 : vector<16x1xi32>
    %c10 = arith.constant 10 : index
    %64 = memref.load %arg0[%c10] : memref<12xi32, #tpu.memory_space<smem>>
    %65 = vector.broadcast %64 : i32 to vector<16x1xi32>
    %66 = arith.select %63, %65, %52 : vector<16x1xi1>, vector<16x1xi32>
    %c4_16 = arith.constant 4 : index
    %c0_17 = arith.constant 0 : index
    %67 = vector.load %arg3[%c4_16, %c0_17] : memref<6x4xf32, #tpu.memory_space<vmem>>, vector<1x4xf32>
    %68 = vector.shape_cast %63 : vector<16x1xi1> to vector<16x1xi1>
    %69 = vector.broadcast %68 : vector<16x1xi1> to vector<16x4xi1>
    %70 = vector.shape_cast %67 : vector<1x4xf32> to vector<1x4xf32>
    %71 = vector.broadcast %70 : vector<1x4xf32> to vector<16x4xf32>
    %72 = arith.select %69, %71, %58 : vector<16x4xi1>, vector<16x4xf32>
    %cst_18 = arith.constant 1.000000e+00 : f32
    %73 = vector.broadcast %cst_18 : f32 to vector<16x1xf32>
    %74 = arith.select %63, %73, %60 : vector<16x1xi1>, vector<16x1xf32>
    %c5 = arith.constant 5 : index
    %75 = memref.load %arg0[%c5] : memref<12xi32, #tpu.memory_space<smem>>
    %76 = vector.broadcast %75 : i32 to vector<16x1xi32>
    %77 = arith.cmpi eq, %2, %76 : vector<16x1xi32>
    %c11 = arith.constant 11 : index
    %78 = memref.load %arg0[%c11] : memref<12xi32, #tpu.memory_space<smem>>
    %79 = vector.broadcast %78 : i32 to vector<16x1xi32>
    %80 = arith.select %77, %79, %66 : vector<16x1xi1>, vector<16x1xi32>
    %c5_19 = arith.constant 5 : index
    %c0_20 = arith.constant 0 : index
    %81 = vector.load %arg3[%c5_19, %c0_20] : memref<6x4xf32, #tpu.memory_space<vmem>>, vector<1x4xf32>
    %82 = vector.shape_cast %77 : vector<16x1xi1> to vector<16x1xi1>
    %83 = vector.broadcast %82 : vector<16x1xi1> to vector<16x4xi1>
    %84 = vector.shape_cast %81 : vector<1x4xf32> to vector<1x4xf32>
    %85 = vector.broadcast %84 : vector<1x4xf32> to vector<16x4xf32>
    %86 = arith.select %83, %85, %72 : vector<16x4xi1>, vector<16x4xf32>
    %cst_21 = arith.constant 1.000000e+00 : f32
    %87 = vector.broadcast %cst_21 : f32 to vector<16x1xf32>
    %88 = arith.select %77, %87, %74 : vector<16x1xi1>, vector<16x1xf32>
    %cst_22 = arith.constant dense<0xFF800000> : vector<16xf32>
    %89 = vector.multi_reduction <maximumf>, %0, %cst_22 [1] : vector<16x5xf32> to vector<16xf32>
    %90 = vector.shape_cast %89 : vector<16xf32> to vector<16x1xf32>
    %91 = vector.broadcast %90 : vector<16x1xf32> to vector<16x5xf32>
    %92 = arith.subf %0, %91 : vector<16x5xf32>
    %93 = math.exp %92 : vector<16x5xf32>
    %cst_23 = arith.constant dense<0.000000e+00> : vector<16xf32>
    %94 = vector.multi_reduction <add>, %93, %cst_23 [1] : vector<16x5xf32> to vector<16xf32>
    %95 = vector.shape_cast %94 : vector<16xf32> to vector<16x1xf32>
    %96 = math.log %95 : vector<16x1xf32>
    %97 = arith.addf %96, %90 : vector<16x1xf32>
    %98 = tpu.iota {dimensions = array<i32: 1>} : vector<16x5xi32>
    %99 = vector.broadcast %80 : vector<16x1xi32> to vector<16x5xi32>
    %100 = arith.cmpi eq, %98, %99 : vector<16x5xi32>
    %101 = arith.extui %100 : vector<16x5xi1> to vector<16x5xi32>
    %102 = arith.sitofp %101 : vector<16x5xi32> to vector<16x5xf32>
    %103 = arith.mulf %0, %102 : vector<16x5xf32>
    %cst_24 = arith.constant dense<0.000000e+00> : vector<16xf32>
    %104 = vector.multi_reduction <add>, %103, %cst_24 [1] : vector<16x5xf32> to vector<16xf32>
    %105 = vector.shape_cast %104 : vector<16xf32> to vector<16x1xf32>
    %c4_i32_25 = arith.constant 4 : i32
    %106 = vector.broadcast %c4_i32_25 : i32 to vector<16x1xi32>
    %107 = arith.cmpi eq, %80, %106 : vector<16x1xi32>
    %cst_26 = arith.constant 1.000000e-01 : f32
    %cst_27 = arith.constant 1.000000e+00 : f32
    %108 = vector.broadcast %cst_26 : f32 to vector<16x1xf32>
    %109 = vector.broadcast %cst_27 : f32 to vector<16x1xf32>
    %110 = arith.select %107, %108, %109 : vector<16x1xi1>, vector<16x1xf32>
    %111 = arith.subf %97, %105 : vector<16x1xf32>
    %112 = arith.mulf %110, %111 : vector<16x1xf32>
    %113 = vector.shape_cast %112 : vector<16x1xf32> to vector<1x16x1xf32>
    %cst_28 = arith.constant dense<0.000000e+00> : vector<1xf32>
    %114 = vector.multi_reduction <add>, %113, %cst_28 [1, 2] : vector<1x16x1xf32> to vector<1xf32>
    %115 = vector.shape_cast %114 : vector<1xf32> to vector<1x1x1xf32>
    %116 = vector.extract %115[0, 0, 0] : f32 from vector<1x1x1xf32>
    %117 = vector.broadcast %116 : f32 to vector<1x1xf32>
    %118 = vector.shape_cast %110 : vector<16x1xf32> to vector<1x16x1xf32>
    %cst_29 = arith.constant dense<0.000000e+00> : vector<1xf32>
    %119 = vector.multi_reduction <add>, %118, %cst_29 [1, 2] : vector<1x16x1xf32> to vector<1xf32>
    %120 = vector.shape_cast %119 : vector<1xf32> to vector<1x1x1xf32>
    %121 = vector.extract %120[0, 0, 0] : f32 from vector<1x1x1xf32>
    %122 = vector.broadcast %121 : f32 to vector<1x1xf32>
    %123 = tpu.reciprocal %122 : vector<1x1xf32> -> vector<1x1xf32>
    %124 = arith.mulf %117, %123 : vector<1x1xf32>
    %125 = arith.subf %1, %86 : vector<16x4xf32>
    %126 = math.absf %125 : vector<16x4xf32>
    %cst_30 = arith.constant dense<0.000000e+00> : vector<16xf32>
    %127 = vector.multi_reduction <add>, %126, %cst_30 [1] : vector<16x4xf32> to vector<16xf32>
    %128 = vector.shape_cast %127 : vector<16xf32> to vector<16x1xf32>
    %129 = arith.mulf %88, %128 : vector<16x1xf32>
    %130 = vector.shape_cast %129 : vector<16x1xf32> to vector<1x16x1xf32>
    %cst_31 = arith.constant dense<0.000000e+00> : vector<1xf32>
    %131 = vector.multi_reduction <add>, %130, %cst_31 [1, 2] : vector<1x16x1xf32> to vector<1xf32>
    %132 = vector.shape_cast %131 : vector<1xf32> to vector<1x1x1xf32>
    %133 = vector.extract %132[0, 0, 0] : f32 from vector<1x1x1xf32>
    %134 = vector.broadcast %133 : f32 to vector<1x1xf32>
    %135 = vector.extract_strided_slice %1 {offsets = [0, 0], sizes = [16, 1], strides = [1, 1]} : vector<16x4xf32> to vector<16x1xf32>
    %136 = vector.extract_strided_slice %1 {offsets = [0, 1], sizes = [16, 1], strides = [1, 1]} : vector<16x4xf32> to vector<16x1xf32>
    %137 = vector.extract_strided_slice %1 {offsets = [0, 2], sizes = [16, 1], strides = [1, 1]} : vector<16x4xf32> to vector<16x1xf32>
    %138 = vector.extract_strided_slice %1 {offsets = [0, 3], sizes = [16, 1], strides = [1, 1]} : vector<16x4xf32> to vector<16x1xf32>
    %cst_32 = arith.constant 5.000000e-01 : f32
    %139 = vector.broadcast %cst_32 : f32 to vector<16x1xf32>
    %140 = arith.mulf %139, %137 : vector<16x1xf32>
    %141 = arith.subf %135, %140 : vector<16x1xf32>
    %cst_33 = arith.constant 5.000000e-01 : f32
    %142 = vector.broadcast %cst_33 : f32 to vector<16x1xf32>
    %143 = arith.mulf %142, %138 : vector<16x1xf32>
    %144 = arith.subf %136, %143 : vector<16x1xf32>
    %cst_34 = arith.constant 5.000000e-01 : f32
    %145 = vector.broadcast %cst_34 : f32 to vector<16x1xf32>
    %146 = arith.mulf %145, %137 : vector<16x1xf32>
    %147 = arith.addf %135, %146 : vector<16x1xf32>
    %cst_35 = arith.constant 5.000000e-01 : f32
    %148 = vector.broadcast %cst_35 : f32 to vector<16x1xf32>
    %149 = arith.mulf %148, %138 : vector<16x1xf32>
    %150 = arith.addf %136, %149 : vector<16x1xf32>
    %151 = vector.extract_strided_slice %86 {offsets = [0, 0], sizes = [16, 1], strides = [1, 1]} : vector<16x4xf32> to vector<16x1xf32>
    %152 = vector.extract_strided_slice %86 {offsets = [0, 1], sizes = [16, 1], strides = [1, 1]} : vector<16x4xf32> to vector<16x1xf32>
    %153 = vector.extract_strided_slice %86 {offsets = [0, 2], sizes = [16, 1], strides = [1, 1]} : vector<16x4xf32> to vector<16x1xf32>
    %154 = vector.extract_strided_slice %86 {offsets = [0, 3], sizes = [16, 1], strides = [1, 1]} : vector<16x4xf32> to vector<16x1xf32>
    %cst_36 = arith.constant 5.000000e-01 : f32
    %155 = vector.broadcast %cst_36 : f32 to vector<16x1xf32>
    %156 = arith.mulf %155, %153 : vector<16x1xf32>
    %157 = arith.subf %151, %156 : vector<16x1xf32>
    %cst_37 = arith.constant 5.000000e-01 : f32
    %158 = vector.broadcast %cst_37 : f32 to vector<16x1xf32>
    %159 = arith.mulf %158, %154 : vector<16x1xf32>
    %160 = arith.subf %152, %159 : vector<16x1xf32>
    %cst_38 = arith.constant 5.000000e-01 : f32
    %161 = vector.broadcast %cst_38 : f32 to vector<16x1xf32>
    %162 = arith.mulf %161, %153 : vector<16x1xf32>
    %163 = arith.addf %151, %162 : vector<16x1xf32>
    %cst_39 = arith.constant 5.000000e-01 : f32
    %164 = vector.broadcast %cst_39 : f32 to vector<16x1xf32>
    %165 = arith.mulf %164, %154 : vector<16x1xf32>
    %166 = arith.addf %152, %165 : vector<16x1xf32>
    %167 = arith.subf %147, %141 : vector<16x1xf32>
    %168 = arith.subf %150, %144 : vector<16x1xf32>
    %169 = arith.mulf %167, %168 : vector<16x1xf32>
    %170 = arith.subf %163, %157 : vector<16x1xf32>
    %171 = arith.subf %166, %160 : vector<16x1xf32>
    %172 = arith.mulf %170, %171 : vector<16x1xf32>
    %173 = arith.minimumf %147, %163 : vector<16x1xf32>
    %174 = arith.maximumf %141, %157 : vector<16x1xf32>
    %175 = arith.subf %173, %174 : vector<16x1xf32>
    %cst_40 = arith.constant 0.000000e+00 : f32
    %176 = vector.broadcast %cst_40 : f32 to vector<16x1xf32>
    %177 = arith.maximumf %175, %176 : vector<16x1xf32>
    %178 = arith.minimumf %150, %166 : vector<16x1xf32>
    %179 = arith.maximumf %144, %160 : vector<16x1xf32>
    %180 = arith.subf %178, %179 : vector<16x1xf32>
    %cst_41 = arith.constant 0.000000e+00 : f32
    %181 = vector.broadcast %cst_41 : f32 to vector<16x1xf32>
    %182 = arith.maximumf %180, %181 : vector<16x1xf32>
    %183 = arith.mulf %177, %182 : vector<16x1xf32>
    %184 = arith.addf %169, %172 : vector<16x1xf32>
    %185 = arith.subf %184, %183 : vector<16x1xf32>
    %186 = arith.maximumf %147, %163 : vector<16x1xf32>
    %187 = arith.minimumf %141, %157 : vector<16x1xf32>
    %188 = arith.subf %186, %187 : vector<16x1xf32>
    %cst_42 = arith.constant 0.000000e+00 : f32
    %189 = vector.broadcast %cst_42 : f32 to vector<16x1xf32>
    %190 = arith.maximumf %188, %189 : vector<16x1xf32>
    %191 = arith.maximumf %150, %166 : vector<16x1xf32>
    %192 = arith.minimumf %144, %160 : vector<16x1xf32>
    %193 = arith.subf %191, %192 : vector<16x1xf32>
    %cst_43 = arith.constant 0.000000e+00 : f32
    %194 = vector.broadcast %cst_43 : f32 to vector<16x1xf32>
    %195 = arith.maximumf %193, %194 : vector<16x1xf32>
    %196 = arith.mulf %190, %195 : vector<16x1xf32>
    %cst_44 = arith.constant 0.000000e+00 : f32
    %197 = vector.broadcast %cst_44 : f32 to vector<16x1xf32>
    %198 = arith.cmpf ogt, %88, %197 : vector<16x1xf32>
    %cst_45 = arith.constant 1.000000e+00 : f32
    %199 = vector.broadcast %cst_45 : f32 to vector<16x1xf32>
    %200 = arith.select %198, %185, %199 : vector<16x1xi1>, vector<16x1xf32>
    %cst_46 = arith.constant 1.000000e+00 : f32
    %201 = vector.broadcast %cst_46 : f32 to vector<16x1xf32>
    %202 = arith.select %198, %196, %201 : vector<16x1xi1>, vector<16x1xf32>
    %203 = tpu.reciprocal %200 {approx = true} : vector<16x1xf32> -> vector<16x1xf32>
    %204 = arith.mulf %200, %203 : vector<16x1xf32>
    %cst_47 = arith.constant 2.000000e+00 : f32
    %205 = vector.broadcast %cst_47 : f32 to vector<16x1xf32>
    %206 = arith.subf %205, %204 : vector<16x1xf32>
    %207 = arith.mulf %203, %206 : vector<16x1xf32>
    %208 = arith.mulf %183, %207 : vector<16x1xf32>
    %209 = arith.subf %202, %200 : vector<16x1xf32>
    %210 = tpu.reciprocal %202 {approx = true} : vector<16x1xf32> -> vector<16x1xf32>
    %211 = arith.mulf %202, %210 : vector<16x1xf32>
    %cst_48 = arith.constant 2.000000e+00 : f32
    %212 = vector.broadcast %cst_48 : f32 to vector<16x1xf32>
    %213 = arith.subf %212, %211 : vector<16x1xf32>
    %214 = arith.mulf %210, %213 : vector<16x1xf32>
    %215 = arith.mulf %209, %214 : vector<16x1xf32>
    %216 = arith.subf %208, %215 : vector<16x1xf32>
    %cst_49 = arith.constant 1.000000e+00 : f32
    %217 = vector.broadcast %cst_49 : f32 to vector<16x1xf32>
    %218 = arith.subf %217, %216 : vector<16x1xf32>
    %219 = arith.mulf %88, %218 : vector<16x1xf32>
    %220 = vector.shape_cast %219 : vector<16x1xf32> to vector<1x16x1xf32>
    %cst_50 = arith.constant dense<0.000000e+00> : vector<1xf32>
    %221 = vector.multi_reduction <add>, %220, %cst_50 [1, 2] : vector<1x16x1xf32> to vector<1xf32>
    %222 = vector.shape_cast %221 : vector<1xf32> to vector<1x1x1xf32>
    %223 = vector.extract %222[0, 0, 0] : f32 from vector<1x1x1xf32>
    %224 = vector.broadcast %223 : f32 to vector<1x1xf32>
    %cst_51 = arith.constant 0.166666672 : f32
    %225 = vector.broadcast %cst_51 : f32 to vector<1x1xf32>
    %226 = arith.mulf %134, %225 : vector<1x1xf32>
    %cst_52 = arith.constant 0.166666672 : f32
    %227 = vector.broadcast %cst_52 : f32 to vector<1x1xf32>
    %228 = arith.mulf %224, %227 : vector<1x1xf32>
    %229 = tpu.iota {dimensions = array<i32: 1>} : vector<1x128xi32>
    %c0_i32 = arith.constant 0 : i32
    %230 = vector.broadcast %c0_i32 : i32 to vector<1x128xi32>
    %231 = arith.cmpi eq, %229, %230 : vector<1x128xi32>
    %c1_i32 = arith.constant 1 : i32
    %232 = vector.broadcast %c1_i32 : i32 to vector<1x128xi32>
    %233 = arith.cmpi eq, %229, %232 : vector<1x128xi32>
    %c2_i32 = arith.constant 2 : i32
    %234 = vector.broadcast %c2_i32 : i32 to vector<1x128xi32>
    %235 = arith.cmpi eq, %229, %234 : vector<1x128xi32>
    %cst_53 = arith.constant 0.000000e+00 : f32
    %236 = vector.shape_cast %228 : vector<1x1xf32> to vector<1x1xf32>
    %237 = vector.broadcast %236 : vector<1x1xf32> to vector<1x128xf32>
    %238 = vector.broadcast %cst_53 : f32 to vector<1x128xf32>
    %239 = arith.select %235, %237, %238 : vector<1x128xi1>, vector<1x128xf32>
    %240 = vector.shape_cast %226 : vector<1x1xf32> to vector<1x1xf32>
    %241 = vector.broadcast %240 : vector<1x1xf32> to vector<1x128xf32>
    %242 = arith.select %233, %241, %239 : vector<1x128xi1>, vector<1x128xf32>
    %243 = vector.shape_cast %124 : vector<1x1xf32> to vector<1x1xf32>
    %244 = vector.broadcast %243 : vector<1x1xf32> to vector<1x128xf32>
    %245 = arith.select %231, %244, %242 : vector<1x128xi1>, vector<1x128xf32>
    %c0_54 = arith.constant 0 : index
    %c0_55 = arith.constant 0 : index
    %246 = vector.load %arg4[%c0_54, %c0_55] : memref<1x128xf32, #tpu.memory_space<vmem>>, vector<1x128xf32>
    tpu.vector_store %arg4[%c0_54, %c0_55], %245 {strides = array<i32>} : memref<1x128xf32, #tpu.memory_space<vmem>>, vector<1x128xf32>,
    return
  }
}

</mosaic_0001>

<bundles_post_ra>
// kernel: neg.2
= control target key start
LH: loop header
LB: loop body
LE: loop exit
PB: predicated region body
PF: predicated region fallthrough
CT: control target
= control target key end

     0   :  { %s24_s0 = inlined_call_operand.vmem [shape: f32[6,8], index: 0, kind: input, shape index: {}]   ;;  %s25_s1 = inlined_call_operand.vmem [shape: f32[6,8], index: 1, kind: output, shape index: {}]  }
   0x1   :  { %v2_v0 = vld [vmem:[%s24_s0] sm:$0x3f] }
   0x2   :  { %v5_v1 = vxor.u32 2147483648, %v2_v0 }
   0x4   :  { %7 = vst [vmem:[%s25_s1] sm:$0xff] %v5_v1 }

// kernel: detr_criterion_forward.1
= control target key start
LH: loop header
LB: loop body
LE: loop exit
PB: predicated region body
PF: predicated region fallthrough
CT: control target
= control target key end

     0   :  { %9 = vsyncpa [#allocation3], 0  ;;  %s479_s18 = smov [#allocation2]   ;;  %s825_s0 = inlined_call_operand.vmem [shape: s32[12], index: 0, kind: input, shape index: {}]   ;;  %s826_s1 = inlined_call_operand.vmem [shape: f32[16,5], index: 1, kind: input, shape index: {}]   ;;  %s827_s2 = inlined_call_operand.vmem [shape: f32[16,4], index: 2, kind: input, shape index: {}]   ;;  %s828_s3 = inlined_call_operand.vmem [shape: f32[6,4], index: 3, kind: input, shape index: {}]   ;;  %s829_s4 = inlined_call_operand.vmem [shape: f32[1,128], index: 4, kind: output, shape index: {}]  }
   0x1   :  { %s15_s17 = sshll.u32 %s825_s0, 4  ;;  %s16_s17 = int_to_ptr.vmem [resolvable:$true] %s15_s17 }
   0x2   :  { %18 = dma.vmem_to_smem %s16_s17, 16, %s479_s18, [#allocation3]  }
   0x3   :  { %477 = dma.done.wait [#allocation3], 16  }
   0x4   :  { %478 = vsyncadd [#allocation3], 4294967280 }
   0x5   :  { %29 = sfence }
   0x6   :  { %v515_v0 = vld [vmem:[%s826_s1] sm:$0xff]  ;;  %vm145_vm0 = vcmask 39936   ;;  %v34_v2 = vlaneseq  ;;  %s37_s23 = sld [smem:[#allocation2]]  ;;  %s480_s26 = smov 126   ;;  %v533_v7 = vld [vmem:[%s826_s1 + $0x8] sm:$0xff]  ;;  %vm240_vm14 = vcmask 31744  }
   0x7   :  { %v520_v1 = vld [vmem:[%s827_s2] sm:$0xff]  ;;  %v146_v3 = vsel %vm145_vm0, %v515_v0, -inf  ;;  %s416_s0 = sld [smem:[#allocation2 + $0x1]]  ;;  %v538_v9 = vld [vmem:[%s827_s2 + $0x8] sm:$0xff]  ;;  %v149_v14 = vsel %vm145_vm0, %v533_v7, -inf  ;;  %s481_s22 = smov 127  }
   0x8   :  { %v262_v4 = vmul.f32 0.5, %v520_v1  ;;  %147 = vmax.xlane.f32.xlu0 %v146_v3  ;;  %v35_v5 = vshrl.u32 %v34_v2, 7  ;;  %v441_v6 = vld [vmem:[%s828_s3] ss:$0 sm:$0xff]  ;;  %s418_s5 = sld [smem:[#allocation2 + $0x2]]  ;;  %v263_v15 = vmul.f32 0.5, %v538_v9 }
   0x9   :  { %s420_s6 = sld [smem:[#allocation2 + $0x3]]  ;;  %v442_v11 = vld [vmem:[%s828_s3 + $0x1] ss:$0 sm:$0xff]  ;;  %v443_v19 = vld [vmem:[%s828_s3 + $0x2] ss:$0 sm:$0xff] }
   0xa   :  { %266 = vrot.lane.b32.xlu1 %v262_v4, %s480_s26  ;;  %v36_v8 = vadd.s32 8, %v35_v5  ;;  %s422_s9 = sld [smem:[#allocation2 + $0x4]]  ;;  %v444_v22 = vld [vmem:[%s828_s3 + $0x3] ss:$0 sm:$0xff]  ;;  %v445_v25 = vld [vmem:[%s828_s3 + $0x4] ss:$0 sm:$0xff] }
   0xb   :  { %s554_s1 = sld [smem:[#allocation2 + $0x5]]  ;;  %v446_v29 = vld [vmem:[%s828_s3 + $0x5] ss:$0 sm:$0xff] }
   0xc   :  { %v38_v10 = vstv %s37_s23  ;;  %s644_s3 = sld [smem:[#allocation2 + $0x6]] }
   0xd   :  { %vm543_vm1 = vcmp.eq.s32.totalorder %v35_v5, %v38_v10  ;;  %vm547_vm2 = vcmp.eq.s32.totalorder %v36_v8, %v38_v10  ;;  %v56_v18 = vstv %s416_s0  ;;  %s646_s17 = sld [smem:[#allocation2 + $0x7]] }
   0xe   :  { %v51_v16 = vsel %vm543_vm1, %v441_v6, %v520_v1  ;;  %v52_v17 = vsel %vm547_vm2, %v441_v6, %v538_v9  ;;  %vm565_vm3 = vcmp.eq.s32.totalorder %v35_v5, %v56_v18  ;;  %vm569_vm4 = vcmp.eq.s32.totalorder %v36_v8, %v56_v18  ;;  %s648_s18 = sld [smem:[#allocation2 + $0x8]] }
   0xf   :  { %v69_v23 = vsel %vm565_vm3, %v442_v11, %v51_v16  ;;  %v74_v24 = vstv %s418_s5  ;;  %v92_v28 = vstv %s420_s6  ;;  %v70_v30 = vsel %vm569_vm4, %v442_v11, %v52_v17  ;;  %s651_s19 = sld [smem:[#allocation2 + $0x9]] }
  0x10   :  { %150 = vmax.xlane.f32.xlu0 %v149_v14  ;;  %vm582_vm5 = vcmp.eq.s32.totalorder %v35_v5, %v74_v24  ;;  %vm586_vm6 = vcmp.eq.s32.totalorder %v36_v8, %v74_v24  ;;  %vm597_vm7 = vcmp.eq.s32.totalorder %v35_v5, %v92_v28  ;;  %vm601_vm8 = vcmp.eq.s32.totalorder %v36_v8, %v92_v28  ;;  %s658_s20 = sld [smem:[#allocation2 + $0xa]] }
  0x11   :  { %v87_v31 = vsel %vm582_vm5, %v443_v19, %v69_v23  ;;  %v110_v34 = vstv %s422_s9  ;;  %v128_v38 = vstv %s554_s1  ;;  %v88_v41 = vsel %vm586_vm6, %v443_v19, %v70_v30  ;;  %s671_s21 = sld [smem:[#allocation2 + $0xb]] }
  0x12   :  { %268 = vrot.lane.b32.xlu1 %v263_v15, %s480_s26  ;;  %v105_v35 = vsel %vm597_vm7, %v444_v22, %v87_v31  ;;  %vm607_vm9 = vcmp.eq.s32.totalorder %v35_v5, %v110_v34  ;;  %vm611_vm10 = vcmp.eq.s32.totalorder %v36_v8, %v110_v34  ;;  %vm618_vm11 = vcmp.eq.s32.totalorder %v35_v5, %v128_v38 }
  0x13   :  { %v123_v39 = vsel %vm607_vm9, %v445_v25, %v105_v35  ;;  %v106_v43 = vsel %vm601_vm8, %v444_v22, %v88_v41  ;;  %vm630_vm12 = vcmp.eq.s32.totalorder %v36_v8, %v128_v38  ;;  %v42_v49 = vstv %s644_s3 }
  0x14   :  { %v626_v42 = vsel %vm618_vm11, %v446_v29, %v123_v39  ;;  %v124_v46 = vsel %vm611_vm10, %v445_v25, %v106_v43  ;;  %v44_v50 = vsel %vm547_vm2, %v42_v49, 4  ;;  %v60_v51 = vstv %s646_s17 }
  0x15   :  { %v276_v45 = vmul.f32 0.5, %v626_v42  ;;  %v640_v47 = vsel %vm630_vm12, %v446_v29, %v124_v46  ;;  %v62_v54 = vsel %vm569_vm4, %v60_v51, %v44_v50  ;;  %v78_v58 = vstv %s648_s18 }
  0x16   :  { %v277_v48 = vmul.f32 0.5, %v640_v47  ;;  %v80_v62 = vsel %vm586_vm6, %v78_v58, %v62_v54  ;;  %v96_v63 = vstv %s651_s19  ;;  %v114_v4 = vstv %s658_s20 }
  0x17   :  { %280 = vrot.lane.b32.xlu2 %v276_v45, %s480_s26  ;;  %v98_v3 = vsel %vm601_vm8, %v96_v63, %v80_v62  ;;  %v132_v15 = vstv %s671_s21  ;;  %v699_v19 = vand.u32 127, %v34_v2  ;;  %v482_v29 = vmov 0.0  }
  0x18   :  { %v116_v14 = vsel %vm611_vm10, %v114_v4, %v98_v3 }
  0x19   :  { %v704_v23 = vsel %vm630_vm12, %v132_v15, %v116_v14 }
  0x1a   :  { %vm173_vm13 = vcmp.eq.s32.totalorder %v699_v19, %v704_v23 }
  0x1b   :  { %v427_v30 = vsel %vm173_vm13, 1.0, %v482_v29 }
  0x1c   :  { %v179_v38 = vmul.f32 %v427_v30, %v533_v7 }
  0x1e   :  { %v183_v43 = vsel %vm145_vm0, %v179_v38, 0.0 }
  0x1f   :  { %282 = vrot.lane.b32.xlu2 %v277_v48, %s480_s26 }
  0x71   :  { %v281_v59 = vpop.permute.xlu2 %280 }
  0x72   :  { %v286_v5 = vsub.f32 %v626_v42, %v281_v59  ;;  %v288_v6 = vadd.f32 %v281_v59, %v626_v42 }
  0x74   :  { %v693_v11 = vsub.f32 %v288_v6, %v286_v5 }
  0x79   :  { %v283_v17 = vpop.permute.xlu2 %282 }
  0x7a   :  { %v287_v24 = vsub.f32 %v640_v47, %v283_v17  ;;  %v289_v25 = vadd.f32 %v283_v17, %v640_v47 }
  0x7b   :  { %v660_v53 = vpop.xlane.xlu0 %147 }
  0x7c   :  { %v267_v52 = vpop.permute.xlu1 %266  ;;  %v152_v57 = vsub.f32 %v515_v0, %v660_v53  ;;  %v712_v2 = vsub.f32 %v289_v25, %v287_v24 }
  0x7d   :  { %v272_v55 = vsub.f32 %v520_v1, %v267_v52  ;;  %v274_v56 = vadd.f32 %v267_v52, %v520_v1 }
  0x7e   :  { %v154_v60 = vmul.f32 1.442695, %v152_v57 }
  0x7f   :  { %v673_v61 = vsub.f32 %v274_v56, %v272_v55  ;;  %v314_v31 = vmin.f32 %v274_v56, %v288_v6  ;;  %v316_v34 = vmax.f32 %v272_v55, %v286_v5  ;;  %v336_v45 = vmax.f32 %v274_v56, %v288_v6 }
  0x80   :  { %447 = vpow2.f32 %v154_v60  ;;  %v338_v46 = vmin.f32 %v272_v55, %v286_v5 }
  0x81   :  { %294 = vrot.lane.b32.xlu2 %v673_v61, %s481_s22  ;;  %v318_v39 = vsub.f32 %v314_v31, %v316_v34  ;;  %v53_v31 = vsel %vm543_vm1, 1.0, %v482_v29 }
  0x82   :  { %v340_v59 = vsub.f32 %v336_v45, %v338_v46 }
  0x83   :  { %v689_v8 = vpop.xlane.xlu0 %150  ;;  %v320_v52 = vmax.f32 %v318_v39, 0.0 }
  0x84   :  { %v153_v10 = vsub.f32 %v533_v7, %v689_v8  ;;  %v269_v41 = vpop.permute.xlu1 %268  ;;  %v342_v55 = vmax.f32 %v340_v59, 0.0 }
  0x85   :  { %v273_v48 = vsub.f32 %v538_v9, %v269_v41  ;;  %v275_v50 = vadd.f32 %v269_v41, %v538_v9 }
  0x86   :  { %v156_v16 = vmul.f32 1.442695, %v153_v10  ;;  %v448_v18 = vpop.eup %447  ;;  %v43_v10 = vsel %vm543_vm1, %v42_v49, 4  ;;  %v237_v49 = vsub.f32 %v538_v9, %v640_v47  ;;  %v236_v9 = vsub.f32 %v520_v1, %v626_v42 }
  0x87   :  { %v158_v22 = vsel %vm145_vm0, %v448_v18, 0.0  ;;  %v722_v54 = vsub.f32 %v275_v50, %v273_v48  ;;  %v315_v57 = vmin.f32 %v275_v50, %v289_v25  ;;  %v317_v7 = vmax.f32 %v273_v48, %v287_v24 }
  0x88   :  { %449 = vpow2.f32 %v156_v16  ;;  %159 = vadd.xlane.f32.xlu0 %v158_v22  ;;  %v337_v60 = vmax.f32 %v275_v50, %v289_v25  ;;  %v339_v62 = vmin.f32 %v273_v48, %v287_v24  ;;  %v61_v14 = vsel %vm565_vm3, %v60_v51, %v43_v10 }
  0x89   :  { %306 = vrot.lane.b32.xlu2 %v693_v11, %s481_s22  ;;  %v726_v56 = vsub.f32 %v315_v57, %v317_v7  ;;  %v79_v16 = vsel %vm582_vm5, %v78_v58, %v61_v14  ;;  %v239_v22 = vand.u32 2147483647, %v237_v49  ;;  %v238_v47 = vand.u32 2147483647, %v236_v9 }
  0x8a   :  { %v731_v5 = vsub.f32 %v337_v60, %v339_v62  ;;  %v97_v17 = vsel %vm597_vm7, %v96_v63, %v79_v16  ;;  %v54_v1 = vsel %vm547_vm2, 1.0, %v482_v29  ;;  %vm194_vm2 = vcmask 7168  }
  0x8b   :  { %v321_v3 = vmax.f32 %v726_v56, 0.0  ;;  %v115_v18 = vsel %vm607_vm9, %v114_v4, %v97_v17  ;;  %v244_v51 = vsel %vm240_vm14, %v239_v22, 0.0  ;;  %v241_v4 = vsel %vm240_vm14, %v238_v47, 0.0 }
  0x8c   :  { %v343_v6 = vmax.f32 %v731_v5, 0.0  ;;  %v759_v24 = vsel %vm618_vm11, %v132_v15, %v115_v18  ;;  %v72_v26 = vsel %vm569_vm4, 1.0, %v54_v1 }
  0x8d   :  { %vm172_vm15 = vcmp.eq.s32.totalorder %v699_v19, %v759_v24  ;;  %vm186_vm4 = vcmp.eq.s32.totalorder %v759_v24, 4 }
  0x8e   :  { %v450_v28 = vpop.eup %449  ;;  %v426_v58 = vsel %vm172_vm15, 1.0, %v482_v29  ;;  %v90_v29 = vsel %vm586_vm6, 1.0, %v72_v26  ;;  %vm405_vm6 = vcmp.eq.s32.totalorder %v699_v19, 2 }
  0x8f   :  { %v161_v35 = vsel %vm145_vm0, %v450_v28, 0.0  ;;  %v178_v63 = vmul.f32 %v426_v58, %v515_v0 }
  0x90   :  { %162 = vadd.xlane.f32.xlu1 %v161_v35  ;;  %v71_v35 = vsel %vm565_vm3, 1.0, %v53_v31  ;;  %vm187_vm3 = vcmp.eq.s32.totalorder %v704_v23, 4 }
  0x91   :  { %308 = vrot.lane.b32.xlu2 %v712_v2, %s481_s22  ;;  %v180_v25 = vsel %vm145_vm0, %v178_v63, 0.0  ;;  %v89_v0 = vsel %vm582_vm5, 1.0, %v71_v35 }
  0x92   :  { %v107_v38 = vsel %vm597_vm7, 1.0, %v89_v0 }
  0x93   :  { %v125_v12 = vsel %vm607_vm9, 1.0, %v107_v38 }
  0x94   :  { %v785_v32 = vsel %vm618_vm11, 1.0, %v125_v12  ;;  %vm403_vm11 = vcmp.eq.s32.totalorder %v699_v19, 0 }
  0x95   :  { %vm354_vm0 = vcmp.gt.f32.partialorder %v785_v32, 0.0 }
  0x98   :  { %184 = vadd.xlane.f32.xlu1 %v183_v43 }
  0x99   :  { %324 = vrot.lane.b32.xlu2 %v320_v52, %s481_s22 }
  0x9c   :  { %296 = vrot.lane.b32.xlu0 %v722_v54, %s481_s22 }
  0xa0   :  { %245 = vadd.xlane.f32.xlu1 %v244_v51 }
  0xa1   :  { %346 = vrot.lane.b32.xlu2 %v342_v55, %s481_s22 }
  0xa4   :  { %326 = vrot.lane.b32.xlu0 %v321_v3, %s481_s22 }
  0xac   :  { %348 = vrot.lane.b32.xlu0 %v343_v6, %s481_s22 }
  0xca   :  { %181 = vadd.xlane.f32.xlu2 %v180_v25 }
  0xd6   :  { %242 = vadd.xlane.f32.xlu0 %v241_v4 }
  0xdb   :  { %v295_v15 = vpop.permute.xlu2 %294 }
  0xdc   :  { %v300_v43 = vmul.f32 %v295_v15, %v673_v61  ;;  %v108_v61 = vsel %vm601_vm8, 1.0, %v90_v29 }
  0xdd   :  { %v126_v21 = vsel %vm611_vm10, 1.0, %v108_v61  ;;  %vm404_vm10 = vcmp.eq.s32.totalorder %v699_v19, 1 }
  0xde   :  { %v798_v27 = vsel %vm630_vm12, 1.0, %v126_v21 }
  0xdf   :  { %vm355_vm1 = vcmp.gt.f32.partialorder %v798_v27, 0.0 }
  0xe3   :  { %v307_v28 = vpop.permute.xlu2 %306 }
  0xe4   :  { %v312_v39 = vmul.f32 %v307_v28, %v693_v11 }
  0xe6   :  { %v332_v45 = vadd.f32 %v312_v39, %v300_v43 }
  0xeb   :  { %v309_v30 = vpop.permute.xlu2 %308 }
  0xec   :  { %v313_v50 = vmul.f32 %v309_v30, %v712_v2 }
  0xf3   :  { %v325_v34 = vpop.permute.xlu2 %324 }
  0xf4   :  { %v330_v20 = vmul.f32 %v325_v34, %v320_v52 }
  0xf6   :  { %v334_v11 = vsub.f32 %v332_v45, %v330_v20 }
  0xf8   :  { %v356_v48 = vsel %vm354_vm0, %v334_v11, 1.0 }
  0xfb   :  { %v160_v42 = vpop.xlane.xlu0 %159  ;;  %v347_v41 = vpop.permute.xlu2 %346 }
  0xfc   :  { %v352_v13 = vmul.f32 %v347_v41, %v342_v55 }
  0xfe   :  { %v358_v46 = vsel %vm354_vm0, %v352_v13, 1.0  ;;  %v483_v13 = vmov 1.0  }
  0xff   :  { %451 = vrcp.f32 %v358_v46  ;;  %v370_v18 = vsub.f32 %v358_v46, %v356_v48  ;;  %v189_v29 = vsel %vm187_vm3, 0.1, %v483_v13 }
 0x100   :  { %453 = vrcp.f32 %v356_v48  ;;  %v209_v24 = vsel %vm194_vm2, %v189_v29, 0.0 }
 0x103   :  { %v163_v49 = vpop.xlane.xlu1 %162 }
 0x105   :  { %v452_v59 = vpop.eup %451 }
 0x106   :  { %v454_v55 = vpop.eup %453  ;;  %v374_v56 = vmul.f32 %v452_v59, %v358_v46 }
 0x107   :  { %v362_v60 = vmul.f32 %v454_v55, %v356_v48 }
 0x108   :  { %v376_v62 = vsub.f32 2.0, %v374_v56 }
 0x109   :  { %v364_v44 = vsub.f32 2.0, %v362_v60 }
 0x10a   :  { %v378_v16 = vmul.f32 %v452_v59, %v376_v62 }
 0x10b   :  { %v366_v17 = vmul.f32 %v454_v55, %v364_v44  ;;  %v185_v41 = vpop.xlane.xlu1 %184 }
 0x10c   :  { %v380_v22 = vmul.f32 %v378_v16, %v370_v18 }
 0x10d   :  { %v368_v63 = vmul.f32 %v366_v17, %v330_v20 }
 0x10e   :  { %v297_v36 = vpop.permute.xlu0 %296 }
 0x10f   :  { %v301_v40 = vmul.f32 %v297_v36, %v722_v54  ;;  %v382_v4 = vsub.f32 %v368_v63, %v380_v22 }
 0x111   :  { %v333_v57 = vadd.f32 %v313_v50, %v301_v40  ;;  %v384_v31 = vsub.f32 1.0, %v382_v4 }
 0x113   :  { %v386_v38 = vmul.f32 %v384_v31, %v785_v32 }
 0x116   :  { %v327_v52 = vpop.permute.xlu0 %326 }
 0x117   :  { %v331_v7 = vmul.f32 %v327_v52, %v321_v3  ;;  %v246_v52 = vpop.xlane.xlu1 %245 }
 0x119   :  { %v335_v33 = vsub.f32 %v333_v57, %v331_v7 }
 0x11b   :  { %v357_v37 = vsel %vm355_vm1, %v335_v33, 1.0 }
 0x11c   :  { %455 = vrcp.f32 %v357_v37 }
 0x11e   :  { %v349_v54 = vpop.permute.xlu0 %348 }
 0x11f   :  { %v353_v2 = vmul.f32 %v349_v54, %v343_v6 }
 0x121   :  { %v359_v10 = vsel %vm355_vm1, %v353_v2, 1.0 }
 0x122   :  { %v456_v14 = vpop.eup %455  ;;  %457 = vrcp.f32 %v359_v10  ;;  %v371_v5 = vsub.f32 %v359_v10, %v357_v37 }
 0x123   :  { %v363_v3 = vmul.f32 %v456_v14, %v357_v37  ;;  %459 = vlog2.f32 %v163_v49 }
 0x124   :  { %461 = vlog2.f32 %v160_v42  ;;  %v388_v42 = vsel %vm194_vm2, %v386_v38, 0.0 }
 0x125   :  { %v365_v51 = vsub.f32 2.0, %v363_v3 }
 0x127   :  { %v367_v9 = vmul.f32 %v456_v14, %v365_v51 }
 0x128   :  { %v458_v58 = vpop.eup %457 }
 0x129   :  { %v375_v25 = vmul.f32 %v458_v58, %v359_v10  ;;  %v460_v15 = vpop.eup %459  ;;  %v369_v28 = vmul.f32 %v367_v9, %v331_v7  ;;  %v248_v7 = vmul.f32 %v246_v52, %v798_v27 }
 0x12a   :  { %v167_v34 = vmul.f32 0.6931472, %v460_v15  ;;  %v462_v1 = vpop.eup %461 }
 0x12b   :  { %v377_v47 = vsub.f32 2.0, %v375_v25  ;;  %v165_v43 = vmul.f32 0.6931472, %v462_v1  ;;  %v250_v55 = vsel %vm194_vm2, %v248_v7, 0.0 }
 0x12c   :  { %v169_v39 = vadd.f32 %v167_v34, %v689_v8  ;;  %v188_v8 = vsel %vm186_vm4, 0.1, %v483_v13 }
 0x12d   :  { %v379_v6 = vmul.f32 %v458_v58, %v377_v47  ;;  %v168_v11 = vadd.f32 %v165_v43, %v660_v53  ;;  %v208_v50 = vsel %vm194_vm2, %v188_v8, 0.0 }
 0x12e   :  { %v191_v45 = vsub.f32 %v169_v39, %v185_v41  ;;  %v210_v57 = vadd.f32 %v209_v24, %v208_v50 }
 0x12f   :  { %v381_v30 = vmul.f32 %v379_v6, %v371_v5 }
 0x130   :  { %v193_v46 = vmul.f32 %v191_v45, %v189_v29 }
 0x131   :  { %v383_v35 = vsub.f32 %v369_v28, %v381_v30 }
 0x132   :  { %v196_v21 = vsel %vm194_vm2, %v193_v46, 0.0 }
 0x133   :  { %v385_v0 = vsub.f32 1.0, %v383_v35 }
 0x135   :  { %v387_v12 = vmul.f32 %v385_v0, %v798_v27 }
 0x137   :  { %v389_v20 = vsel %vm194_vm2, %v387_v12, 0.0 }
 0x138   :  { %v390_v26 = vadd.f32 %v389_v20, %v388_v42 }
 0x13a   :  { %391 = vadd.xlane.f32.xlu2 %v390_v26 }
 0x13d   :  { %v182_v36 = vpop.xlane.xlu2 %181 }
 0x13e   :  { %v190_v61 = vsub.f32 %v168_v11, %v182_v36 }
 0x140   :  { %v192_v23 = vmul.f32 %v190_v61, %v188_v8 }
 0x142   :  { %v195_v48 = vsel %vm194_vm2, %v192_v23, 0.0 }
 0x143   :  { %v197_v40 = vadd.f32 %v196_v21, %v195_v48 }
 0x145   :  { %198 = vadd.xlane.f32.xlu1 %v197_v40 }
 0x149   :  { %v243_v53 = vpop.xlane.xlu0 %242 }
 0x14a   :  { %v247_v59 = vmul.f32 %v243_v53, %v785_v32 }
 0x14c   :  { %v249_v33 = vsel %vm194_vm2, %v247_v59, 0.0 }
 0x14d   :  { %211 = vadd.xlane.f32.xlu1 %v210_v57  ;;  %v251_v56 = vadd.f32 %v250_v55, %v249_v33 }
 0x155   :  { %252 = vadd.xlane.f32.xlu1 %v251_v56 }
 0x1ad   :  { %v392_v62 = vpop.xlane.xlu2 %391 }
 0x1ae   :  { %v393_v10 = vrot.slane %v392_v62, 4 }
 0x1b0   :  { %v394_v32 = vadd.f32 %v393_v10, %v392_v62 }
 0x1b2   :  { %v395_v22 = vrot.slane %v394_v32, 2 }
 0x1b4   :  { %v396_v47 = vadd.f32 %v395_v22, %v394_v32 }
 0x1b6   :  { %v397_v6 = vrot.slane %v396_v47, 1 }
 0x1b8   :  { %v199_v37 = vpop.xlane.xlu1 %198  ;;  %v398_v30 = vadd.f32 %v397_v6, %v396_v47 }
 0x1b9   :  { %v200_v60 = vrot.slane %v199_v37, 4 }
 0x1bb   :  { %v201_v54 = vadd.f32 %v200_v60, %v199_v37 }
 0x1bd   :  { %v202_v2 = vrot.slane %v201_v54, 2 }
 0x1bf   :  { %v203_v44 = vadd.f32 %v202_v2, %v201_v54 }
 0x1c0   :  { %v212_v14 = vpop.xlane.xlu1 %211 }
 0x1c1   :  { %v213_v16 = vrot.slane %v212_v14, 4  ;;  %v204_v27 = vrot.slane %v203_v44, 1 }
 0x1c3   :  { %v214_v3 = vadd.f32 %v213_v16, %v212_v14  ;;  %v205_v17 = vadd.f32 %v204_v27, %v203_v44 }
 0x1c5   :  { %v215_v18 = vrot.slane %v214_v3, 2  ;;  %428 = vpush %v205_v17 }
 0x1c7   :  { %v216_v49 = vadd.f32 %v215_v18, %v214_v3 }
 0x1c8   :  { %v253_v51 = vpop.xlane.xlu1 %252 }
 0x1c9   :  { %v254_v58 = vrot.slane %v253_v51, 4  ;;  %v217_v63 = vrot.slane %v216_v49, 1 }
 0x1cb   :  { %v255_v25 = vadd.f32 %v254_v58, %v253_v51  ;;  %v218_v9 = vadd.f32 %v217_v63, %v216_v49 }
 0x1cd   :  { %v256_v4 = vrot.slane %v255_v25, 2  ;;  %430 = vpush %v218_v9 }
 0x1cf   :  { %v257_v5 = vadd.f32 %v256_v4, %v255_v25 }
 0x1d1   :  { %v258_v15 = vrot.slane %v257_v5, 1 }
 0x1d3   :  { %v259_v28 = vadd.f32 %v258_v15, %v257_v5 }
 0x1d5   :  { %432 = vpush %v259_v28 }
 0x1d6   :  { %434 = vpush %v398_v30 }
 0x1f6   :  { %s429_s23 = spop %428 }
 0x1f7   :  { %v207_v29 = vstv %s429_s23 }
 0x1fe   :  { %s431_s0 = spop %430 }
 0x1ff   :  { %v220_v31 = vstv %s431_s0 }
 0x200   :  { %463 = vrcp.f32 %v220_v31  ;;  %v230_v1 = vand.u32 2147483647, %v220_v31  ;;  %v232_v39 = vand.u32 2147483648, %v220_v31  ;;  %vm226_vm7 = vweird.f32 %v220_v31 }
 0x202   :  { %v233_v20 = vor.u32 1.1754944e-38, %v232_v39  ;;  %vm231_vm9 = vcmp.eq.f32.partialorder %v230_v1, 8.507059e+37 }
 0x206   :  { %v464_v34 = vpop.eup %463  ;;  %s433_s24 = spop %432 }
 0x207   :  { %v222_v35 = vmul.f32 %v464_v34, %v220_v31  ;;  %s435_s25 = spop %434  ;;  %vm227_vm5 = vweird.f32 %v464_v34  ;;  %v261_v41 = vstv %s433_s24 }
 0x208   :  { %v400_v0 = vstv %s435_s25  ;;  %vm228_vm8 = vmor %vm226_vm7, %vm227_vm5  ;;  %v401_v26 = vmul.f32 0.16666667, %v261_v41 }
 0x209   :  { %v223_v38 = vsub.f32 1.0, %v222_v35  ;;  %v402_v43 = vmul.f32 0.16666667, %v400_v0 }
 0x20b   :  { %v224_v12 = vmul.f32 %v464_v34, %v223_v38  ;;  %v406_v13 = vsel %vm405_vm6, %v402_v43, 0.0 }
 0x20c   :  { %v407_v36 = vsel %vm404_vm10, %v401_v26, %v406_v13 }
 0x20d   :  { %v225_v42 = vadd.f32 %v464_v34, %v224_v12 }
 0x20f   :  { %v229_v45 = vsel %vm228_vm8, %v464_v34, %v225_v42 }
 0x210   :  { %v234_v11 = vsel %vm231_vm9, %v233_v20, %v229_v45 }
 0x211   :  { %v235_v8 = vmul.f32 %v234_v11, %v207_v29 }
 0x213   :  { %v408_v46 = vsel %vm403_vm11, %v235_v8, %v407_v36 }
 0x214   :  { %409 = vst [vmem:[%s829_s4] sm:$0x1] %v408_v46 }
 0x215   :  { %414 = vsyncpa [#allocation3], 1 }

</bundles_post_ra>
